<compile_context>
chip_gen: v6e
topology: v6e:2x2x1
jax: 0.10.0
libtpu: 0.0.40
codegen_flags: <defaults>
</compile_context>

<pallas_src>
import functools

import jax
import jax.numpy as jnp
import numpy as np
from jax.experimental import pallas as pl
from jax.experimental.pallas import tpu as pltpu


# ----------------------------------------------------------------------------- helpers

def _round_up(x, m):
    return ((x + m - 1) // m) * m


def _vmem_capacity_bytes():
    try:
        info = pltpu.get_tpu_info()
        cap = getattr(info, "vmem_capacity_bytes", None)
        if cap:
            return int(cap)
    except Exception:
        pass
    return 64 * 1024 * 1024          # conservative (v7x per-TC); v5e/v6e have more


def _probe_buffered():
    try:
        pl.BlockSpec((8, 128), lambda i, j: (0, 0), pipeline_mode=pl.Buffered(1))
        return True
    except Exception:
        return False


_HAS_BUFFERED = _probe_buffered()


def _choose_tiles(B, S, D, emb_bytes, mm_bytes, batch_tile, seq_tile, emb_buffers):
    """VMEM-aware (tb, ts) selection. Returns (tb, ts, n_buf, mask_tail, vmem_limit)."""
    cap = _vmem_capacity_bytes()
    budget = int(0.75 * cap)
    weight_copies = 1 if _HAS_BUFFERED else 2
    Dp = _round_up(D, 128)

    # --- batch tile: divisor of B, multiple of 8 (or full B); >=2 tiles when possible
    tb_target = min(batch_tile, B)
    if B >= 16:
        tb_target = min(tb_target, max(8, B // 2))       # megacore: keep >=2 batch tiles
    tb = B
    for t in range(min(tb_target, B), 0, -1):
        if B % t == 0 and t % 8 == 0:
            tb = t
            break
    tbp = _round_up(tb, 8)

    resident = (weight_copies * 2 * D * Dp * mm_bytes      # w1a + w2
                + weight_copies * 3 * 8 * Dp * 4           # gamma, beta, b2 (sublane-padded)
                + 2 * tbp * Dp * 4                         # per-row bias (double-buffered)
                + 2 * tbp * Dp * 4                         # output (double-buffered)
                + tbp * Dp * 4)                            # f32 accumulator scratch

    sub_mult = 8 if emb_bytes >= 4 else (16 if emb_bytes == 2 else 32)
    n_buf = emb_buffers if emb_buffers else 2
    per_row = tb * Dp * emb_bytes                          # bytes per unit of ts per buffer
    avail = max(budget - resident, n_buf * sub_mult * per_row)
    ts_cap = max(sub_mult, int(avail // (n_buf * per_row)))
    if seq_tile is not None:
        ts_cap = min(ts_cap, max(1, int(seq_tile)))
    ts_cap = min(ts_cap, S)

    mask_tail = False
    if S <= ts_cap:
        ts = S                                             # full axis (always legal)
    else:
        ts_cap = max(sub_mult, (ts_cap // sub_mult) * sub_mult)
        ts = None
        for t in range(ts_cap, sub_mult - 1, -1):
            if S % t == 0 and t % sub_mult == 0:
                ts = t
                break
        if ts is None:                                     # awkward S: cdiv grid + tail mask
            ts = ts_cap
            mask_tail = True

    ns = -(-S // ts)
    if emb_buffers is None:
        blk_bytes = tb * _round_up(ts, sub_mult) * Dp * emb_bytes
        n_buf = 3 if (_HAS_BUFFERED and blk_bytes <= 2 * 2**20) else 2
    else:
        n_buf = emb_buffers
    n_buf = min(n_buf, max(2, ns))                         # no point buffering past the grid

    est = resident + n_buf * tb * _round_up(ts, sub_mult) * Dp * emb_bytes
    vmem_limit = int(min(0.92 * cap, max(32 * 2**20, 1.25 * est)))
    return tb, ts, n_buf, mask_tail, vmem_limit


# ----------------------------------------------------------------------------- kernel

def _structured_reasoning_kernel(
    emb_ref,    # (TB, TS, D) native dtype — embeddings tile (streamed)
    bias_ref,   # (TB, D)     f32          — eth*rowsum_even + man*rowsum_odd + b1
    w1a_ref,    # (D, D)      matmul_dtype — first half of fusion Linear #1 (acts on mean_emb)
    g_ref,      # (1, D)      f32          — LayerNorm gamma
    be_ref,     # (1, D)      f32          — LayerNorm beta
    w2_ref,     # (D, D)      matmul_dtype — fusion Linear #2
    b2_ref,     # (1, D)      f32
    out_ref,    # (TB, D)     f32
    acc_ref,    # (TB, D)     f32 scratch  — running sum over the sequence axis
    *,
    inv_seq_len: float,
    matmul_dtype,
    seq_len: int,
    mask_tail: bool,
):
    s = pl.program_id(1)

    @pl.when(s == 0)
    def _():
        acc_ref[...] = jnp.zeros_like(acc_ref)

    # Running sequence sum for mean_emb; accumulate in f32 without materializing
    # an f32 copy of the whole tile.
    if mask_tail:
        ts_blk = emb_ref.shape[1]
        pos = jax.lax.broadcasted_iota(jnp.int32, (ts_blk, 1), 0) + s * ts_blk
        valid = (pos < seq_len)[None, :, :]                       # (1, TS, 1)
        x = jnp.where(valid, emb_ref[...].astype(jnp.float32), 0.0)
        acc_ref[...] += jnp.sum(x, axis=1)
    else:
        acc_ref[...] += jnp.sum(emb_ref[...], axis=1, dtype=jnp.float32)

    @pl.when(s == pl.num_programs(1) - 1)
    def _():
        mean_emb = acc_ref[...] * inv_seq_len                     # (TB, D) f32

        # Linear(2D -> D): mean_emb @ W1a + (rank-2 score contribution + b1)
        h = jnp.dot(mean_emb.astype(matmul_dtype), w1a_ref[...],
                    preferred_element_type=jnp.float32)
        h = h + bias_ref[...]                                     # (TB, D) f32

        # LayerNorm(D), eps = 1e-5 (PyTorch default)
        mu = jnp.mean(h, axis=-1, keepdims=True)
        var = jnp.mean(jnp.square(h - mu), axis=-1, keepdims=True)
        hn = (h - mu) * jax.lax.rsqrt(var + 1e-5) * g_ref[...] + be_ref[...]

        # Exact (erf) GELU, matching nn.GELU() default.
        act = 0.5 * hn * (1.0 + jax.lax.erf(hn * 0.7071067811865476))

        out = jnp.dot(act.astype(matmul_dtype), w2_ref[...],
                      preferred_element_type=jnp.float32) + b2_ref[...]
        out_ref[...] = out.astype(out_ref.dtype)


# ----------------------------------------------------------------------------- wrapper

def structured_reasoning_forward(embeddings, ethics_scores, manipulation_scores, params,
                                 *, matmul_dtype=jnp.float32,
                                 batch_tile=128, seq_tile=None, emb_buffers=None):
    """embeddings: (B, S, D); ethics/manipulation scores: (B, 1)."""
    B, S, D = embeddings.shape
    assert D % 2 == 0, "repeat(1, d_model//2) requires an even d_model (as in PyTorch)"

    f32 = jnp.float32
    w1 = params["w1"].astype(f32)                                # (2D, D)
    w1a = w1[:D].astype(matmul_dtype)                            # acts on mean_emb
    w1b = w1[D:]                                                 # acts on rep (rank-2)
    w1b_even = jnp.sum(w1b[0::2], axis=0)                        # (D,)  ethics rows
    w1b_odd = jnp.sum(w1b[1::2], axis=0)                         # (D,)  manip rows
    w2 = params["w2"].astype(matmul_dtype)                       # (D, D)
    b1 = params["b1"].astype(f32)                                # (1, D)
    gamma = params["ln_gamma"].astype(f32)
    beta = params["ln_beta"].astype(f32)
    b2 = params["b2"].astype(f32)

    # Per-row epilogue bias (rank-2 score contribution + b1): O(B*D) wrapper work,
    # removes the lane-masked (B,1) score blocks and three broadcasts from the kernel.
    bias_rows = (ethics_scores.astype(f32) * w1b_even[None, :]
                 + manipulation_scores.astype(f32) * w1b_odd[None, :]
                 + b1)                                           # (B, D) f32

    emb_bytes = jnp.dtype(embeddings.dtype).itemsize
    mm_bytes = jnp.dtype(matmul_dtype).itemsize
    tb, ts, n_buf, mask_tail, vmem_limit = _choose_tiles(
        B, S, D, emb_bytes, mm_bytes, batch_tile, seq_tile, emb_buffers)
    grid = (B // tb, pl.cdiv(S, ts))

    def _const_spec(shape):
        if _HAS_BUFFERED:
            return pl.BlockSpec(shape, lambda b, s: (0, 0), pipeline_mode=pl.Buffered(1))
        return pl.BlockSpec(shape, lambda b, s: (0, 0))

    emb_kwargs = {}
    if _HAS_BUFFERED and n_buf != 2:
        emb_kwargs["pipeline_mode"] = pl.Buffered(n_buf)

    in_specs = [
        pl.BlockSpec((tb, ts, D), lambda b, s: (b, s, 0), **emb_kwargs),   # streamed
        pl.BlockSpec((tb, D), lambda b, s: (b, 0)),                        # per-row bias
        _const_spec((D, D)),                                               # w1a (resident)
        _const_spec((1, D)),                                               # gamma
        _const_spec((1, D)),                                               # beta
        _const_spec((D, D)),                                               # w2 (resident)
        _const_spec((1, D)),                                               # b2
    ]
    out_specs = pl.BlockSpec((tb, D), lambda b, s: (b, 0))                 # resident across S

    kernel = functools.partial(
        _structured_reasoning_kernel,
        inv_seq_len=1.0 / float(S),
        matmul_dtype=matmul_dtype,
        seq_len=S,
        mask_tail=mask_tail,
    )

    cost = pl.CostEstimate(
        flops=int(4 * B * D * D + B * S * D),
        transcendentals=int(2 * B * D),
        bytes_accessed=int(B * S * D * emb_bytes + 2 * D * D * mm_bytes
                           + 2 * B * D * 4 + 3 * D * 4),
    )

    fused = pl.pallas_call(
        kernel,
        out_shape=jax.ShapeDtypeStruct((B, D), jnp.float32),
        grid_spec=pltpu.PrefetchScalarGridSpec(
            num_scalar_prefetch=0,
            grid=grid,
            in_specs=in_specs,
            out_specs=out_specs,
            scratch_shapes=[pltpu.VMEM((tb, D), jnp.float32)],
        ),
        compiler_params=pltpu.CompilerParams(
            dimension_semantics=("parallel", "arbitrary"),
            vmem_limit_bytes=vmem_limit,
        ),
        cost_estimate=cost,
    )(embeddings, bias_rows, w1a, gamma, beta, w2, b2)

    # PyTorch's .expand is a view; broadcast lazily here to match the (B, S, D)
    # output contract without an extra HBM-sized writeback kernel.  The (B, D)
    # result is also returned so consumers can avoid materializing the broadcast.
    structured_embeddings = jnp.broadcast_to(fused[:, None, :], (B, S, D))
    return {
        "structured_embeddings": structured_embeddings,
        "fused_embeddings": fused,
        "ethics_score": ethics_scores,
        "manipulation_score": manipulation_scores,
    }


# ----------------------------------------------------------------------------- reference

def _reference_forward(embeddings, ethics_scores, manipulation_scores, params):
    """Pure-JAX reference mirroring the PyTorch forward tensor math (f32)."""
    B, S, D = embeddings.shape
    mean_emb = embeddings.astype(jnp.float32).mean(axis=1)
    scores = jnp.concatenate([ethics_scores, manipulation_scores], axis=1)   # (B, 2)
    rep = jnp.tile(scores, (1, D // 2))                                      # (B, D)
    x = jnp.concatenate([mean_emb, rep], axis=1)                             # (B, 2D)
    h = x @ params["w1"] + params["b1"][0]
    mu = h.mean(axis=-1, keepdims=True)
    var = ((h - mu) ** 2).mean(axis=-1, keepdims=True)
    hn = (h - mu) / jnp.sqrt(var + 1e-5) * params["ln_gamma"][0] + params["ln_beta"][0]
    act = 0.5 * hn * (1.0 + jax.lax.erf(hn / jnp.sqrt(2.0)))
    out = act @ params["w2"] + params["b2"][0]
    return jnp.broadcast_to(out[:, None, :], (B, S, D))


def init_params(d_model, key):
    k1, k2 = jax.random.split(key)
    scale = 0.02
    return {
        "w1": scale * jax.random.normal(k1, (2 * d_model, d_model), jnp.float32),
        "b1": jnp.zeros((1, d_model), jnp.float32),
        "ln_gamma": jnp.ones((1, d_model), jnp.float32),
        "ln_beta": jnp.zeros((1, d_model), jnp.float32),
        "w2": scale * jax.random.normal(k2, (d_model, d_model), jnp.float32),
        "b2": jnp.zeros((1, d_model), jnp.float32),
    }


if __name__ == "__main__":
    key = jax.random.PRNGKey(0)
    k_emb, k_eth, k_man, k_par, k_emb2 = jax.random.split(key, 5)

    # --- test 1: small shapes, f32, full-axis tiles -----------------------------------
    B, S, D = 2, 8, 32
    embeddings = jax.random.normal(k_emb, (B, S, D), jnp.float32)
    ethics_scores = jax.nn.sigmoid(jax.random.normal(k_eth, (B, 1), jnp.float32))
    manipulation_scores = jax.nn.sigmoid(jax.random.normal(k_man, (B, 1), jnp.float32))
    params = init_params(D, k_par)

    ref = _reference_forward(embeddings, ethics_scores, manipulation_scores, params)
    out = structured_reasoning_forward(embeddings, ethics_scores, manipulation_scores, params)
    jax.block_until_ready(out)
    np.testing.assert_allclose(
        np.asarray(out["structured_embeddings"]), np.asarray(ref), rtol=1e-4, atol=1e-5)
    assert out["structured_embeddings"].shape == (B, S, D)
    assert out["fused_embeddings"].shape == (B, D)
    assert out["ethics_score"].shape == (B, 1)
    assert out["manipulation_score"].shape == (B, 1)

    # --- test 2: non-divisible sequence -> cdiv grid + in-kernel tail masking ---------
    S2 = 12
    embeddings2 = jax.random.normal(k_emb2, (B, S2, D), jnp.float32)
    ref2 = _reference_forward(embeddings2, ethics_scores, manipulation_scores, params)
    out2 = structured_reasoning_forward(embeddings2, ethics_scores, manipulation_scores,
                                        params, seq_tile=8)
    jax.block_until_ready(out2)
    np.testing.assert_allclose(
        np.asarray(out2["structured_embeddings"]), np.asarray(ref2), rtol=1e-4, atol=1e-5)

    # --- test 3: bf16 MXU path (epilogue-only cast; embeddings stay f32) --------------
    out_bf16 = structured_reasoning_forward(
        embeddings, ethics_scores, manipulation_scores, params, matmul_dtype=jnp.bfloat16)
    jax.block_until_ready(out_bf16)
    np.testing.assert_allclose(
        np.asarray(out_bf16["structured_embeddings"]), np.asarray(ref), rtol=5e-2, atol=5e-2)

    print("KERNEL_OK")
</pallas_src>

<mosaic_0001>
module attributes {stable_mosaic.version = 11 : i64} {
  func.func @_structured_reasoning_kernel(%arg0: i32, %arg1: i32, %arg2: memref<2x8x32xf32, #tpu.memory_space<vmem>>, %arg3: memref<2x32xf32, #tpu.memory_space<vmem>>, %arg4: memref<32x32xf32, #tpu.memory_space<vmem>>, %arg5: memref<1x32xf32, #tpu.memory_space<vmem>>, %arg6: memref<1x32xf32, #tpu.memory_space<vmem>>, %arg7: memref<32x32xf32, #tpu.memory_space<vmem>>, %arg8: memref<1x32xf32, #tpu.memory_space<vmem>>, %arg9: memref<2x32xf32, #tpu.memory_space<vmem>>, %arg10: memref<2x32xf32, #tpu.memory_space<vmem>>) attributes {dimension_semantics = [#tpu.dimension_semantics<parallel>, #tpu.dimension_semantics<arbitrary>], iteration_bounds = array<i64: 1, 1>, scalar_prefetch = 0 : i64, scratch_operands = 1 : i64, tpu.core_type = #tpu.core_type<tc>, window_params = [{transform_indices = @transform_0, window_bounds = array<i64: 2, 8, 32>}, {transform_indices = @transform_1, window_bounds = array<i64: 2, 32>}, {pipeline_mode = #tpu.pipeline_mode<synchronous>, transform_indices = @transform_2, window_bounds = array<i64: 32, 32>}, {pipeline_mode = #tpu.pipeline_mode<synchronous>, transform_indices = @transform_3, window_bounds = array<i64: 1, 32>}, {pipeline_mode = #tpu.pipeline_mode<synchronous>, transform_indices = @transform_4, window_bounds = array<i64: 1, 32>}, {pipeline_mode = #tpu.pipeline_mode<synchronous>, transform_indices = @transform_5, window_bounds = array<i64: 32, 32>}, {pipeline_mode = #tpu.pipeline_mode<synchronous>, transform_indices = @transform_6, window_bounds = array<i64: 1, 32>}, {transform_indices = @transform_7, window_bounds = array<i64: 2, 32>}]} {
    %c0_i32 = arith.constant 0 : i32
    %0 = arith.cmpi eq, %arg1, %c0_i32 : i32
    %1 = arith.extui %0 : i1 to i32
    %c0_i32_0 = arith.constant 0 : i32
    %2 = arith.cmpi ne, %1, %c0_i32_0 : i32
    scf.if %2 {
      %cst_9 = arith.constant 0.000000e+00 : f32
      %11 = vector.broadcast %cst_9 : f32 to vector<2x32xf32>
      %c0_10 = arith.constant 0 : index
      %c0_11 = arith.constant 0 : index
      %12 = vector.load %arg10[%c0_10, %c0_11] : memref<2x32xf32, #tpu.memory_space<vmem>>, vector<2x32xf32>
      tpu.vector_store %arg10[%c0_10, %c0_11], %11 {strides = array<i32>} : memref<2x32xf32, #tpu.memory_space<vmem>>, vector<2x32xf32>,
    } else {
    }
    %c0 = arith.constant 0 : index
    %c0_1 = arith.constant 0 : index
    %3 = vector.load %arg10[%c0, %c0_1] : memref<2x32xf32, #tpu.memory_space<vmem>>, vector<2x32xf32>
    %c0_2 = arith.constant 0 : index
    %c0_3 = arith.constant 0 : index
    %c0_4 = arith.constant 0 : index
    %4 = vector.load %arg2[%c0_2, %c0_3, %c0_4] : memref<2x8x32xf32, #tpu.memory_space<vmem>>, vector<2x8x32xf32>
    %cst = arith.constant dense<0.000000e+00> : vector<2x32xf32>
    %5 = vector.multi_reduction <add>, %4, %cst [1] : vector<2x8x32xf32> to vector<2x32xf32>
    %6 = arith.addf %3, %5 : vector<2x32xf32>
    %c0_5 = arith.constant 0 : index
    %c0_6 = arith.constant 0 : index
    %7 = vector.load %arg10[%c0_5, %c0_6] : memref<2x32xf32, #tpu.memory_space<vmem>>, vector<2x32xf32>
    tpu.vector_store %arg10[%c0_5, %c0_6], %6 {strides = array<i32>} : memref<2x32xf32, #tpu.memory_space<vmem>>, vector<2x32xf32>,
    %c0_i32_7 = arith.constant 0 : i32
    %8 = arith.cmpi eq, %arg1, %c0_i32_7 : i32
    %9 = arith.extui %8 : i1 to i32
    %c0_i32_8 = arith.constant 0 : i32
    %10 = arith.cmpi ne, %9, %c0_i32_8 : i32
    scf.if %10 {
      %c0_9 = arith.constant 0 : index
      %c0_10 = arith.constant 0 : index
      %11 = vector.load %arg10[%c0_9, %c0_10] : memref<2x32xf32, #tpu.memory_space<vmem>>, vector<2x32xf32>
      %cst_11 = arith.constant 1.250000e-01 : f32
      %12 = vector.broadcast %cst_11 : f32 to vector<2x32xf32>
      %13 = arith.mulf %11, %12 : vector<2x32xf32>
      %c0_12 = arith.constant 0 : index
      %c0_13 = arith.constant 0 : index
      %14 = vector.load %arg4[%c0_12, %c0_13] : memref<32x32xf32, #tpu.memory_space<vmem>>, vector<32x32xf32>
      %cst_14 = arith.constant dense<0.000000e+00> : vector<2x32xf32>
      %15 = tpu.matmul %13, %14, %cst_14 {dimension_numbers = #tpu.dot_dimension_numbers<[1], [0], [0], [1], [0, 0, 1, 1], [], []>} : vector<2x32xf32>, vector<32x32xf32>, vector<2x32xf32> -> vector<2x32xf32>
      %c0_15 = arith.constant 0 : index
      %c0_16 = arith.constant 0 : index
      %16 = vector.load %arg3[%c0_15, %c0_16] : memref<2x32xf32, #tpu.memory_space<vmem>>, vector<2x32xf32>
      %17 = arith.addf %15, %16 : vector<2x32xf32>
      %cst_17 = arith.constant dense<0.000000e+00> : vector<2xf32>
      %18 = vector.multi_reduction <add>, %17, %cst_17 [1] : vector<2x32xf32> to vector<2xf32>
      %19 = vector.shape_cast %18 : vector<2xf32> to vector<2x1xf32>
      %cst_18 = arith.constant 3.200000e+01 : f32
      %20 = vector.broadcast %cst_18 : f32 to vector<2x1xf32>
      %21 = arith.divf %19, %20 : vector<2x1xf32>
      %22 = vector.broadcast %21 : vector<2x1xf32> to vector<2x32xf32>
      %23 = arith.subf %17, %22 : vector<2x32xf32>
      %24 = arith.mulf %23, %23 : vector<2x32xf32>
      %cst_19 = arith.constant dense<0.000000e+00> : vector<2xf32>
      %25 = vector.multi_reduction <add>, %24, %cst_19 [1] : vector<2x32xf32> to vector<2xf32>
      %26 = vector.shape_cast %25 : vector<2xf32> to vector<2x1xf32>
      %cst_20 = arith.constant 3.200000e+01 : f32
      %27 = vector.broadcast %cst_20 : f32 to vector<2x1xf32>
      %28 = arith.divf %26, %27 : vector<2x1xf32>
      %29 = vector.broadcast %21 : vector<2x1xf32> to vector<2x32xf32>
      %30 = arith.subf %17, %29 : vector<2x32xf32>
      %cst_21 = arith.constant 9.99999974E-6 : f32
      %31 = vector.broadcast %cst_21 : f32 to vector<2x1xf32>
      %32 = arith.addf %28, %31 : vector<2x1xf32>
      %33 = math.rsqrt %32 : vector<2x1xf32>
      %34 = vector.broadcast %33 : vector<2x1xf32> to vector<2x32xf32>
      %35 = arith.mulf %30, %34 : vector<2x32xf32>
      %c0_22 = arith.constant 0 : index
      %c0_23 = arith.constant 0 : index
      %36 = vector.load %arg5[%c0_22, %c0_23] : memref<1x32xf32, #tpu.memory_space<vmem>>, vector<1x32xf32>
      %37 = vector.broadcast %36 : vector<1x32xf32> to vector<2x32xf32>
      %38 = arith.mulf %35, %37 : vector<2x32xf32>
      %c0_24 = arith.constant 0 : index
      %c0_25 = arith.constant 0 : index
      %39 = vector.load %arg6[%c0_24, %c0_25] : memref<1x32xf32, #tpu.memory_space<vmem>>, vector<1x32xf32>
      %40 = vector.broadcast %39 : vector<1x32xf32> to vector<2x32xf32>
      %41 = arith.addf %38, %40 : vector<2x32xf32>
      %cst_26 = arith.constant 5.000000e-01 : f32
      %42 = vector.broadcast %cst_26 : f32 to vector<2x32xf32>
      %43 = arith.mulf %42, %41 : vector<2x32xf32>
      %cst_27 = arith.constant 0.707106769 : f32
      %44 = vector.broadcast %cst_27 : f32 to vector<2x32xf32>
      %45 = arith.mulf %41, %44 : vector<2x32xf32>
      %46 = math.erf %45 : vector<2x32xf32>
      %cst_28 = arith.constant 1.000000e+00 : f32
      %47 = vector.broadcast %cst_28 : f32 to vector<2x32xf32>
      %48 = arith.addf %47, %46 : vector<2x32xf32>
      %49 = arith.mulf %43, %48 : vector<2x32xf32>
      %c0_29 = arith.constant 0 : index
      %c0_30 = arith.constant 0 : index
      %50 = vector.load %arg7[%c0_29, %c0_30] : memref<32x32xf32, #tpu.memory_space<vmem>>, vector<32x32xf32>
      %cst_31 = arith.constant dense<0.000000e+00> : vector<2x32xf32>
      %51 = tpu.matmul %49, %50, %cst_31 {dimension_numbers = #tpu.dot_dimension_numbers<[1], [0], [0], [1], [0, 0, 1, 1], [], []>} : vector<2x32xf32>, vector<32x32xf32>, vector<2x32xf32> -> vector<2x32xf32>
      %c0_32 = arith.constant 0 : index
      %c0_33 = arith.constant 0 : index
      %52 = vector.load %arg8[%c0_32, %c0_33] : memref<1x32xf32, #tpu.memory_space<vmem>>, vector<1x32xf32>
      %53 = vector.broadcast %52 : vector<1x32xf32> to vector<2x32xf32>
      %54 = arith.addf %51, %53 : vector<2x32xf32>
      %c0_34 = arith.constant 0 : index
      %c0_35 = arith.constant 0 : index
      %55 = vector.load %arg9[%c0_34, %c0_35] : memref<2x32xf32, #tpu.memory_space<vmem>>, vector<2x32xf32>
      tpu.vector_store %arg9[%c0_34, %c0_35], %54 {strides = array<i32>} : memref<2x32xf32, #tpu.memory_space<vmem>>, vector<2x32xf32>,
    } else {
    }
    return
  }
  func.func @transform_0(%arg0: i32, %arg1: i32) -> (i32, i32, i32) {
    %c0_i32 = arith.constant 0 : i32
    %c0_i32_0 = arith.constant 0 : i32
    return %arg0, %arg1, %c0_i32 : i32, i32, i32
  }
  func.func @transform_1(%arg0: i32, %arg1: i32) -> (i32, i32) {
    %c0_i32 = arith.constant 0 : i32
    %c0_i32_0 = arith.constant 0 : i32
    return %arg0, %c0_i32 : i32, i32
  }
  func.func @transform_2(%arg0: i32, %arg1: i32) -> (i32, i32) {
    %c0_i32 = arith.constant 0 : i32
    %c0_i32_0 = arith.constant 0 : i32
    %c0_i32_1 = arith.constant 0 : i32
    return %c0_i32, %c0_i32_0 : i32, i32
  }
  func.func @transform_3(%arg0: i32, %arg1: i32) -> (i32, i32) {
    %c0_i32 = arith.constant 0 : i32
    %c0_i32_0 = arith.constant 0 : i32
    %c0_i32_1 = arith.constant 0 : i32
    return %c0_i32, %c0_i32_0 : i32, i32
  }
  func.func @transform_4(%arg0: i32, %arg1: i32) -> (i32, i32) {
    %c0_i32 = arith.constant 0 : i32
    %c0_i32_0 = arith.constant 0 : i32
    %c0_i32_1 = arith.constant 0 : i32
    return %c0_i32, %c0_i32_0 : i32, i32
  }
  func.func @transform_5(%arg0: i32, %arg1: i32) -> (i32, i32) {
    %c0_i32 = arith.constant 0 : i32
    %c0_i32_0 = arith.constant 0 : i32
    %c0_i32_1 = arith.constant 0 : i32
    return %c0_i32, %c0_i32_0 : i32, i32
  }
  func.func @transform_6(%arg0: i32, %arg1: i32) -> (i32, i32) {
    %c0_i32 = arith.constant 0 : i32
    %c0_i32_0 = arith.constant 0 : i32
    %c0_i32_1 = arith.constant 0 : i32
    return %c0_i32, %c0_i32_0 : i32, i32
  }
  func.func @transform_7(%arg0: i32, %arg1: i32) -> (i32, i32) {
    %c0_i32 = arith.constant 0 : i32
    %c0_i32_0 = arith.constant 0 : i32
    return %arg0, %c0_i32 : i32, i32
  }
}

</mosaic_0001>

<bundles_post_ra>
// kernel: tpu_custom_call.1
= control target key start
LH: loop header
LB: loop body
LE: loop exit
PB: predicated region body
PF: predicated region fallthrough
CT: control target
= control target key end

     0   :  { %12 = vsyncpa [#allocation4], 0  ;;  %s583_s0 = inlined_call_operand.hbm [shape: f32[2,8,32], index: 0, kind: input, shape index: {}]   ;;  %s584_s1 = inlined_call_operand.hbm [shape: f32[2,32], index: 1, kind: input, shape index: {}]   ;;  %s585_s2 = inlined_call_operand.hbm [shape: f32[32,32], index: 2, kind: input, shape index: {}]   ;;  %s586_s3 = inlined_call_operand.vmem [shape: f32[1,32], index: 3, kind: input, shape index: {}]   ;;  %s587_s4 = inlined_call_operand.vmem [shape: f32[1,32], index: 4, kind: input, shape index: {}]   ;;  %s588_s5 = inlined_call_operand.hbm [shape: f32[32,32], index: 5, kind: input, shape index: {}]   ;;  %s589_s6 = inlined_call_operand.vmem [shape: f32[1,32], index: 6, kind: input, shape index: {}]   ;;  %s590_s7 = inlined_call_operand.hbm [shape: f32[2,32], index: 7, kind: output, shape index: {}]  }
   0x1   :  { %13 = vsyncpa [#allocation7], 0 }
   0x2   :  { %14 = vsyncpa [#allocation10], 0 }
   0x3   :  { %15 = vsyncpa [#allocation5], 0  ;;  %s490_s24 = smov [#allocation6]   ;;  %s491_s26 = smov [#allocation3]  }
   0x4   :  { %s34_s25 = sshll.u32 %s490_s24, 4  ;;  %s21_s27 = sshll.u32 %s491_s26, 4  ;;  %s35_s25 = int_to_ptr.vmem [resolvable:$true] %s34_s25  ;;  %s22_s27 = int_to_ptr.vmem [resolvable:$true] %s21_s27 }
   0x5   :  { %s390_s28 = scalar_lea.vmem %s35_s25, 32  ;;  %p395_p1 = scmp.lt.s32.totalorder %s35_s25, %s35_s25 }
   0x6   :  { %p391_p0 = scmp.ne.s32.totalorder %s35_s25, %s390_s28  ;;  %p396_p2 = scmp.lt.s32.totalorder %s390_s28, %s390_s28 }
   0x8   :  { %p397_p3 = por %p396_p2, %p395_p1 }
   0xa   :  { %p398_p4 = pnand %p397_p3, %p391_p0 }
   0xc   :  { %401 = shalt.err (!%p398_p4)
}
   0xd   :  { %37 = dma.hbm_to_vmem [thread:$0]  %s584_s1, 32, %s35_s25, [#allocation7]  }
   0xe   :  { %s410_s8 = scalar_lea.vmem %s22_s27, 256  ;;  %p415_p6 = scmp.lt.s32.totalorder %s22_s27, %s22_s27 }
   0xf   :  { %p411_p5 = scmp.ne.s32.totalorder %s22_s27, %s410_s8  ;;  %p416_p7 = scmp.lt.s32.totalorder %s410_s8, %s410_s8 }
  0x11   :  { %p417_p8 = por %p416_p7, %p415_p6 }
  0x13   :  { %p418_p9 = pnand %p417_p8, %p411_p5 }
  0x15   :  { %421 = shalt.err (!%p418_p9)
}
  0x16   :  { %s492_s9 = smov 128   ;;  %s493_s10 = smov 8  }
  0x17   :  { %27 = dma.hbm_to_vmem [thread:$0]  %s583_s0, 256, %s22_s27, [#allocation4], %s492_s9, %s492_s9, %s493_s10  }
  0x18   :  { %s494_s13 = smov [#allocation8]   ;;  %s495_s15 = smov [#allocation9]  }
  0x19   :  { %s43_s14 = sshll.u32 %s494_s13, 4  ;;  %s59_s16 = sshll.u32 %s495_s15, 4  ;;  %s44_s14 = int_to_ptr.vmem [resolvable:$true] %s43_s14  ;;  %s60_s16 = int_to_ptr.vmem [resolvable:$true] %s59_s16 }
  0x1a   :  { %s430_s1 = scalar_lea.vmem %s44_s14, 512  ;;  %p435_p11 = scmp.lt.s32.totalorder %s44_s14, %s44_s14 }
  0x1b   :  { %p431_p10 = scmp.ne.s32.totalorder %s44_s14, %s430_s1  ;;  %p436_p12 = scmp.lt.s32.totalorder %s430_s1, %s430_s1 }
  0x1d   :  { %p437_p13 = por %p436_p12, %p435_p11 }
  0x1f   :  { %p438_p0 = pnand %p437_p13, %p431_p10 }
  0x21   :  { %441 = shalt.err (!%p438_p0)
}
  0x22   :  { %49 = dma.hbm_to_vmem [thread:$0]  %s585_s2, 512, %s44_s14, [#allocation7], %s492_s9, %s492_s9, %s493_s10  }
  0x23   :  { %s450_s19 = scalar_lea.vmem %s60_s16, 512  ;;  %p455_p2 = scmp.lt.s32.totalorder %s60_s16, %s60_s16 }
  0x24   :  { %p451_p1 = scmp.ne.s32.totalorder %s60_s16, %s450_s19  ;;  %p456_p3 = scmp.lt.s32.totalorder %s450_s19, %s450_s19 }
  0x26   :  { %p457_p4 = por %p456_p3, %p455_p2 }
  0x28   :  { %p458_p5 = pnand %p457_p4, %p451_p1 }
  0x2a   :  { %461 = shalt.err (!%p458_p5)
}
  0x2b   :  { %65 = dma.hbm_to_vmem [thread:$0]  %s588_s5, 512, %s60_s16, [#allocation10], %s492_s9, %s492_s9, %s493_s10  }
  0x2c   :  { %482 = dma.done.wait [#allocation4], 256  }
  0x2d   :  { %483 = vsyncadd [#allocation4], 4294967040 }
  0x2e   :  { %484 = dma.done.wait [#allocation7], 544  }
  0x2f   :  { %485 = vsyncadd [#allocation7], 4294966752 }
  0x30   :  { %486 = dma.done.wait [#allocation10], 512  }
  0x31   :  { %487 = vsyncadd [#allocation10], 4294966784  ;;  %vm84_vm0 = vcmask 254976   ;;  %v496_v0 = vmov 0.0   ;;  %vm497_vm1 = vmmov 0   ;;  %vm89_vm2 = vcmask 261120  }
  0x32   :  { %347 = vmatprep.subr.mxu0 %v496_v0  ;;  %355 = vmatprep.mubr.msk.f32.mxu0 %vm497_vm1, %v496_v0  ;;  %85 = vst.msk [vmem:[#allocation2] sm:$0x3] %vm84_vm0, %v496_v0  ;;  %v120_v1 = vld [vmem:[#allocation8 + $0x18] sm:$0xff]  ;;  %v119_v2 = vld [vmem:[#allocation8 + $0x10] sm:$0xff]  ;;  %v118_v4 = vld [vmem:[#allocation8 + $0x8] sm:$0xff]  ;;  %vm106_vm3 = vcmask 1041409  }
  0x33   :  { %358 = vmatprep.subr.mxu1 %v496_v0  ;;  %366 = vmatprep.mubr.msk.f32.mxu1 %vm497_vm1, %v496_v0  ;;  %v87_v3 = vld [vmem:[#allocation3] sm:$0xff]  ;;  %v88_v5 = vld [vmem:[#allocation3 + $0x8] sm:$0xff]  ;;  %v117_v9 = vld [vmem:[#allocation8] sm:$0xff] }
  0x34   :  { %348 = vmatpush3.msra.mxu0 %v120_v1  ;;  %v90_v6 = vsel %vm89_vm2, %v87_v3, 0.0  ;;  %v97_v8 = vsel %vm89_vm2, %v88_v5, 0.0  ;;  %v121_v26 = vld [vmem:[#allocation6] sm:$0x3]  ;;  %v232_v37 = vld [vmem:[#allocation9 + $0x10] sm:$0xff]  ;;  %v231_v38 = vld [vmem:[#allocation9 + $0x8] sm:$0xff] }
  0x35   :  { %349 = vmatprep.subr.mxu0 %v496_v0  ;;  %v91_v7 = vrot.slane %v90_v6, 4  ;;  %v98_v10 = vrot.slane %v97_v8, 4  ;;  %v233_v36 = vld [vmem:[#allocation9 + $0x18] sm:$0xff]  ;;  %v230_v39 = vld [vmem:[#allocation9] sm:$0xff]  ;;  %v333_v44 = vld [vmem:[%s586_s3] ss:$0 sm:$0xff] }
  0x36   :  { %350 = vmatpush3.msra.mxu0 %v119_v2  ;;  %359 = vmatpush3.msra.mxu1 %v233_v36  ;;  %v334_v46 = vld [vmem:[%s587_s4] ss:$0 sm:$0xff]  ;;  %s498_s3 = smov [#allocation11]  }
  0x37   :  { %351 = vmatprep.subr.mxu0 %v496_v0  ;;  %v92_v11 = vadd.f32 %v91_v7, %v90_v6  ;;  %v99_v12 = vadd.f32 %v98_v10, %v97_v8  ;;  %360 = vmatprep.subr.mxu1 %v496_v0  ;;  %v335_v54 = vld [vmem:[%s589_s6] ss:$0 sm:$0xff]  ;;  %s321_s25 = sshll.u32 %s498_s3, 4  ;;  %s322_s25 = int_to_ptr.vmem [resolvable:$true] %s321_s25 }
  0x38   :  { %352 = vmatpush3.msra.mxu0 %v118_v4  ;;  %361 = vmatpush3.msra.mxu1 %v232_v37  ;;  %s462_s4 = scalar_lea.vmem %s322_s25, 32  ;;  %p467_p7 = scmp.lt.s32.totalorder %s322_s25, %s322_s25 }
  0x39   :  { %353 = vmatprep.subr.mxu0 %v496_v0  ;;  %v93_v13 = vrot.slane %v92_v11, 2  ;;  %v100_v14 = vrot.slane %v99_v12, 2  ;;  %v86_v20 = vld [vmem:[#allocation2] sm:$0x3]  ;;  %362 = vmatprep.subr.mxu1 %v496_v0  ;;  %p463_p6 = scmp.ne.s32.totalorder %s322_s25, %s462_s4  ;;  %p468_p8 = scmp.lt.s32.totalorder %s462_s4, %s462_s4 }
  0x3a   :  { %354 = vmatpush3.msra.mxu0 %v117_v9  ;;  %363 = vmatpush3.msra.mxu1 %v231_v38 }
  0x3b   :  { %v94_v15 = vadd.f32 %v93_v13, %v92_v11  ;;  %v101_v16 = vadd.f32 %v100_v14, %v99_v12  ;;  %364 = vmatprep.subr.mxu1 %v496_v0  ;;  %p469_p9 = por %p468_p8, %p467_p7 }
  0x3c   :  { %365 = vmatpush3.msra.mxu1 %v230_v39 }
  0x3d   :  { %v95_v17 = vrot.slane %v94_v15, 1  ;;  %v102_v18 = vrot.slane %v101_v16, 1  ;;  %p470_p10 = pnand %p469_p9, %p463_p6 }
  0x3f   :  { %v96_v19 = vadd.f32 %v95_v17, %v94_v15  ;;  %v103_v21 = vadd.f32 %v102_v18, %v101_v16 }
  0x41   :  { %v107_v22 = vsel %vm106_vm3, %v103_v21, %v96_v19 }
  0x42   :  { %v109_v23 = vadd.f32 %v107_v22, %v86_v20 }
  0x44   :  { %111 = vst.msk [vmem:[#allocation2] sm:$0x3] %vm84_vm0, %v109_v23 }
  0x4b   :  { %v115_v24 = vld [vmem:[#allocation2] sm:$0x3] }
  0x4c   :  { %v116_v25 = vmul.f32 0.125, %v115_v24 }
  0x4e   :  { %356 = vmatmul.mubr.msk.f32.vlgmr.msra.gmra.mxu0 %vm89_vm2, %v116_v25 }
 0x10e   :  { %v191_v27 = vpop.f32.mrf.mxu0 }
 0x10f   :  { %v192_v28 = vadd.f32 %v191_v27, %v121_v26 }
 0x110   :  { %v357_v29 = vpop.f32.mrf.mxu0 }
 0x111   :  { %v195_v30 = vsel %vm84_vm0, %v192_v28, 0.0 }
 0x112   :  { %196 = vadd.xlane.f32.xlu0 %v195_v30 }
 0x19b   :  { %v197_v31 = vpop.xlane.xlu0 %196 }
 0x19c   :  { %v199_v32 = vmul.f32 0.03125, %v197_v31 }
 0x19e   :  { %v200_v33 = vsub.f32 %v192_v28, %v199_v32 }
 0x1a0   :  { %v201_v34 = vmul.f32 %v200_v33, %v200_v33 }
 0x1a2   :  { %v202_v35 = vsel %vm84_vm0, %v201_v34, 0.0 }
 0x1a3   :  { %203 = vadd.xlane.f32.xlu0 %v202_v35 }
 0x22c   :  { %v204_v40 = vpop.xlane.xlu0 %203 }
 0x22d   :  { %v205_v41 = vmul.f32 0.03125, %v204_v40 }
 0x22f   :  { %v206_v42 = vadd.f32 1e-05, %v205_v41 }
 0x231   :  { %378 = vrsqrt.f32 %v206_v42 }
 0x23e   :  { %v379_v43 = vpop.eup %378 }
 0x23f   :  { %v208_v45 = vmul.f32 %v379_v43, %v200_v33 }
 0x241   :  { %v216_v47 = vmul.f32 %v333_v44, %v208_v45 }
 0x243   :  { %v224_v48 = vadd.f32 %v334_v46, %v216_v47 }
 0x245   :  { %v226_v49 = vmul.f32 0.70710677, %v224_v48  ;;  %v225_v51 = vmul.f32 0.5, %v224_v48 }
 0x247   :  { %380 = verf.f32 %v226_v49 }
 0x254   :  { %v381_v50 = vpop.eup %380 }
 0x255   :  { %v228_v52 = vadd.f32 1.0, %v381_v50 }
 0x257   :  { %v229_v53 = vmul.f32 %v228_v52, %v225_v51 }
 0x259   :  { %367 = vmatmul.mubr.msk.f32.vlgmr.msra.gmra.mxu1 %vm89_vm2, %v229_v53 }
 0x319   :  { %v310_v55 = vpop.f32.mrf.mxu1 }
 0x31a   :  { %v311_v56 = vadd.f32 %v335_v54, %v310_v55 }
 0x31b   :  { %v368_v57 = vpop.f32.mrf.mxu1 }
 0x31c   :  { %314 = vst.msk [vmem:[#allocation11] sm:$0x3] %vm84_vm0, %v311_v56 }
 0x31d   :  { %473 = shalt.err (!%p470_p10)
}
 0x31e   :  { %324 = dma.vmem_to_hbm [thread:$0]  %s322_s25, 32, %s590_s7, [#allocation5]  }
 0x31f   :  { %488 = dma.done.wait [#allocation5], 32  }
 0x320   :  { %489 = vsyncadd [#allocation5], 4294967264 }
 0x321   :  { %328 = vsyncpa [#allocation4], 1 }
 0x322   :  { %329 = vsyncpa [#allocation7], 1 }
 0x323   :  { %330 = vsyncpa [#allocation10], 1 }
 0x324   :  { %331 = vsyncpa [#allocation5], 1 }

</bundles_post_ra>
